<compile_context>
chip_gen: v5e
topology: v5e:2x2
jax: 0.10.0
libtpu: 0.0.40
codegen_flags: <defaults>
</compile_context>

<pallas_src>
from functools import partial

import jax
import jax.numpy as jnp
from jax import lax
from jax.experimental import pallas as pl
from jax.experimental.pallas import tpu as pltpu


def _conv_embed_kernel(use_norm, eps, n_valid, patches_ref, w_ref, b_ref,
                       g_ref, beta_ref, o_ref):
    # patches_ref: (tm, Kp) bf16   w_ref: (Kp, Np) bf16
    # b/g/beta:    (1, Np)  f32    o_ref: (tm, Np)
    acc = jnp.dot(patches_ref[...], w_ref[...], preferred_element_type=jnp.float32)
    acc = acc + b_ref[...]
    if use_norm:
        n_pad = acc.shape[-1]
        if n_pad == n_valid:
            # Embedding dim is already lane-aligned: straight LayerNorm.
            mean = jnp.mean(acc, axis=-1, keepdims=True)
            centered = acc - mean
            var = jnp.mean(centered * centered, axis=-1, keepdims=True)
        else:
            # Padded embed columns are exactly zero (zero weight columns +
            # zero bias), so sum/n_valid is the true mean; the variance masks
            # the padded lanes so they contribute nothing. VPU/XLU-only work,
            # hidden under the MXU.
            inv_n = 1.0 / n_valid
            mean = jnp.sum(acc, axis=-1, keepdims=True) * inv_n
            centered = acc - mean
            lane = lax.broadcasted_iota(jnp.int32, (1, n_pad), 1)
            valid = (lane < n_valid).astype(jnp.float32)
            var = jnp.sum((centered * centered) * valid, axis=-1,
                          keepdims=True) * inv_n
        acc = centered * lax.rsqrt(var + eps)
        acc = acc * g_ref[...] + beta_ref[...]   # padded cols -> 0 (sliced off)
    o_ref[...] = acc.astype(o_ref.dtype)


def conv_embed_forward(x, w, b, gamma, beta, *, stride, padding,
                       use_norm=True, eps=1e-5, tm=512,
                       out_layout="NCHW", out_dtype=jnp.float32):
    """ConvEmbed.forward: Conv2d(patch,stride,pad) -> (b, hw, c) -> LayerNorm -> layout."""
    B, Cin, H, W = x.shape
    Cout, _, Kh, Kw = w.shape
    Ho = (H + 2 * padding - Kh) // stride + 1
    Wo = (W + 2 * padding - Kw) // stride + 1

    K = Cin * Kh * Kw
    N = Cout
    M = B * Ho * Wo

    # Cast BEFORE patch extraction (x is Kh*Kw smaller than patches).
    x_bf16 = x.astype(jnp.bfloat16)

    # --- im2col as ONE fused XLA gather.  Output spec NHWC gives a lane-dense
    #     (B, Ho, Wo, Cin*Kh*Kw) tensor whose feature dim is ordered
    #     (Cin, Kh, Kw) -- exactly PyTorch's OIHW weight flattening. ---
    patches = lax.conv_general_dilated_patches(
        x_bf16, filter_shape=(Kh, Kw), window_strides=(stride, stride),
        padding=[(padding, padding), (padding, padding)],
        dimension_numbers=("NCHW", "OIHW", "NHWC"))
    patches = patches.reshape(M, K)                          # bf16 MXU input

    # Lane-align contraction (Kp) and embedding (Np) dims. Zero K columns are
    # inert for the dot; zero N columns are handled inside the kernel's LN.
    Kp = pl.cdiv(K, 128) * 128
    Np = pl.cdiv(N, 128) * 128

    # Adaptive M tile: large enough to feed the MXU and amortize per-grid-step
    # overhead, but no larger than the (128-rounded) problem itself.
    tm = max(128, min(tm, pl.cdiv(M, 128) * 128))
    Mp = pl.cdiv(M, tm) * tm

    if (Mp, Kp) != (M, K):
        # Padded rows are zero patches; they go through bias+LN (finite) and
        # are sliced off after the kernel.
        patches = jnp.pad(patches, ((0, Mp - M), (0, Kp - K)))

    w2 = w.reshape(Cout, K).T.astype(jnp.bfloat16)           # (K, N), VMEM-resident
    w2 = jnp.pad(w2, ((0, Kp - K), (0, Np - N)))
    b2 = jnp.pad(b.reshape(1, N).astype(jnp.float32), ((0, 0), (0, Np - N)))
    g2 = jnp.pad(gamma.reshape(1, N).astype(jnp.float32), ((0, 0), (0, Np - N)))
    beta2 = jnp.pad(beta.reshape(1, N).astype(jnp.float32), ((0, 0), (0, Np - N)))

    cost = pl.CostEstimate(
        flops=2 * Mp * Kp * Np,
        transcendentals=Mp if use_norm else 0,
        bytes_accessed=(Mp * Kp * 2 + Kp * Np * 2
                        + Mp * Np * jnp.dtype(out_dtype).itemsize + 3 * Np * 4),
    )

    grid = (Mp // tm,)
    out2d = pl.pallas_call(
        partial(_conv_embed_kernel, use_norm, eps, N),
        out_shape=jax.ShapeDtypeStruct((Mp, Np), out_dtype),
        grid=grid,
        in_specs=[
            pl.BlockSpec((tm, Kp), lambda i: (i, 0)),   # patches tile (bf16)
            pl.BlockSpec((Kp, Np), lambda i: (0, 0)),   # weight, resident (bf16)
            pl.BlockSpec((1, Np), lambda i: (0, 0)),    # bias (f32)
            pl.BlockSpec((1, Np), lambda i: (0, 0)),    # layernorm gamma (f32)
            pl.BlockSpec((1, Np), lambda i: (0, 0)),    # layernorm beta (f32)
        ],
        out_specs=pl.BlockSpec((tm, Np), lambda i: (i, 0)),
        # M axis is independent -> megacore-shardable on v7x (2 TCs/chip).
        compiler_params=pltpu.CompilerParams(dimension_semantics=("parallel",)),
        cost_estimate=cost,
    )(patches, w2, b2, g2, beta2)

    # Slice + layout; XLA fuses the [:M, :N] slice into this copy.
    out = out2d[:M, :N].reshape(B, Ho, Wo, Cout)
    if out_layout == "NHWC":
        return out                      # tokens-major, no extra HBM transpose
    return out.transpose(0, 3, 1, 2)    # 'b (h w) c -> b c h w' (module semantics)


def _reference(x, w, b, gamma, beta, *, stride, padding, use_norm, eps=1e-5):
    y = jax.lax.conv_general_dilated(
        x, w, window_strides=(stride, stride),
        padding=[(padding, padding), (padding, padding)],
        dimension_numbers=("NCHW", "OIHW", "NCHW"))
    y = y + b.reshape(1, -1, 1, 1)
    B, C, H, W = y.shape
    t = y.transpose(0, 2, 3, 1).reshape(B, H * W, C)        # b c h w -> b (h w) c
    if use_norm:
        mean = jnp.mean(t, axis=-1, keepdims=True)
        var = jnp.mean((t - mean) ** 2, axis=-1, keepdims=True)
        t = (t - mean) * jax.lax.rsqrt(var + eps)
        t = t * gamma.reshape(1, 1, -1) + beta.reshape(1, 1, -1)
    return t.reshape(B, H, W, C).transpose(0, 3, 1, 2)       # b (h w) c -> b c h w


if __name__ == "__main__":
    # Small shapes consistent with ConvEmbed defaults (patch=7, stride=4, pad=2).
    B, Cin, H, W = 2, 4, 16, 16
    embed_dim = 32
    patch_size, stride, padding = 7, 4, 2

    key = jax.random.PRNGKey(0)
    kx, kw, kb = jax.random.split(key, 3)
    x = jax.random.normal(kx, (B, Cin, H, W), dtype=jnp.float32)
    # Deterministic synthetic params (Conv2d weight OIHW + bias, LayerNorm affine).
    w = jax.random.normal(kw, (embed_dim, Cin, patch_size, patch_size), dtype=jnp.float32) * 0.05
    b = jax.random.normal(kb, (embed_dim,), dtype=jnp.float32) * 0.01
    gamma = jnp.ones((embed_dim,), dtype=jnp.float32)
    beta = jnp.zeros((embed_dim,), dtype=jnp.float32)

    out = conv_embed_forward(x, w, b, gamma, beta,
                             stride=stride, padding=padding, use_norm=True)
    out = jax.block_until_ready(out)

    ref = _reference(x, w, b, gamma, beta,
                     stride=stride, padding=padding, use_norm=True)
    assert out.shape == (B, embed_dim, 4, 4), out.shape
    # Tolerance relaxed vs a pure-f32 version: the kernel feeds the MXU in
    # bf16 (f32 accumulation), the reference conv runs in f32.
    assert jnp.allclose(out, ref, atol=5e-2, rtol=5e-2), float(jnp.max(jnp.abs(out - ref)))

    print("KERNEL_OK")
</pallas_src>

<mosaic_0001>
module attributes {stable_mosaic.version = 11 : i64} {
  func.func @_conv_embed_kernel(%arg0: i32, %arg1: memref<128x256xbf16, #tpu.memory_space<vmem>>, %arg2: memref<256x128xbf16, #tpu.memory_space<vmem>>, %arg3: memref<1x128xf32, #tpu.memory_space<vmem>>, %arg4: memref<1x128xf32, #tpu.memory_space<vmem>>, %arg5: memref<1x128xf32, #tpu.memory_space<vmem>>, %arg6: memref<128x128xf32, #tpu.memory_space<vmem>>) attributes {dimension_semantics = [#tpu.dimension_semantics<parallel>], iteration_bounds = array<i64: 1>, scalar_prefetch = 0 : i64, scratch_operands = 0 : i64, tpu.core_type = #tpu.core_type<tc>, window_params = [{transform_indices = @transform_0, window_bounds = array<i64: 128, 256>}, {pipeline_mode = #tpu.pipeline_mode<synchronous>, transform_indices = @transform_1, window_bounds = array<i64: 256, 128>}, {pipeline_mode = #tpu.pipeline_mode<synchronous>, transform_indices = @transform_2, window_bounds = array<i64: 1, 128>}, {pipeline_mode = #tpu.pipeline_mode<synchronous>, transform_indices = @transform_3, window_bounds = array<i64: 1, 128>}, {pipeline_mode = #tpu.pipeline_mode<synchronous>, transform_indices = @transform_4, window_bounds = array<i64: 1, 128>}, {transform_indices = @transform_5, window_bounds = array<i64: 128, 128>}]} {
    %c0 = arith.constant 0 : index
    %c0_0 = arith.constant 0 : index
    %0 = vector.load %arg1[%c0, %c0_0] : memref<128x256xbf16, #tpu.memory_space<vmem>>, vector<128x256xbf16>
    %c0_1 = arith.constant 0 : index
    %c0_2 = arith.constant 0 : index
    %1 = vector.load %arg2[%c0_1, %c0_2] : memref<256x128xbf16, #tpu.memory_space<vmem>>, vector<256x128xbf16>
    %cst = arith.constant dense<0.000000e+00> : vector<128x128xf32>
    %2 = tpu.matmul %0, %1, %cst {dimension_numbers = #tpu.dot_dimension_numbers<[1], [0], [0], [1], [0, 0, 1, 1], [], []>} : vector<128x256xbf16>, vector<256x128xbf16>, vector<128x128xf32> -> vector<128x128xf32>
    %c0_3 = arith.constant 0 : index
    %c0_4 = arith.constant 0 : index
    %3 = vector.load %arg3[%c0_3, %c0_4] : memref<1x128xf32, #tpu.memory_space<vmem>>, vector<1x128xf32>
    %4 = vector.broadcast %3 : vector<1x128xf32> to vector<128x128xf32>
    %5 = arith.addf %2, %4 : vector<128x128xf32>
    %cst_5 = arith.constant dense<0.000000e+00> : vector<128xf32>
    %6 = vector.multi_reduction <add>, %5, %cst_5 [1] : vector<128x128xf32> to vector<128xf32>
    %7 = vector.shape_cast %6 : vector<128xf32> to vector<128x1xf32>
    %cst_6 = arith.constant 3.125000e-02 : f32
    %8 = vector.broadcast %cst_6 : f32 to vector<128x1xf32>
    %9 = arith.mulf %7, %8 : vector<128x1xf32>
    %10 = vector.broadcast %9 : vector<128x1xf32> to vector<128x128xf32>
    %11 = arith.subf %5, %10 : vector<128x128xf32>
    %12 = tpu.iota {dimensions = array<i32: 1>} : vector<1x128xi32>
    %c32_i32 = arith.constant 32 : i32
    %13 = vector.broadcast %c32_i32 : i32 to vector<1x128xi32>
    %14 = arith.cmpi slt, %12, %13 : vector<1x128xi32>
    %15 = arith.extui %14 : vector<1x128xi1> to vector<1x128xi32>
    %16 = arith.sitofp %15 : vector<1x128xi32> to vector<1x128xf32>
    %17 = arith.mulf %11, %11 : vector<128x128xf32>
    %18 = vector.broadcast %16 : vector<1x128xf32> to vector<128x128xf32>
    %19 = arith.mulf %17, %18 : vector<128x128xf32>
    %cst_7 = arith.constant dense<0.000000e+00> : vector<128xf32>
    %20 = vector.multi_reduction <add>, %19, %cst_7 [1] : vector<128x128xf32> to vector<128xf32>
    %21 = vector.shape_cast %20 : vector<128xf32> to vector<128x1xf32>
    %cst_8 = arith.constant 3.125000e-02 : f32
    %22 = vector.broadcast %cst_8 : f32 to vector<128x1xf32>
    %23 = arith.mulf %21, %22 : vector<128x1xf32>
    %cst_9 = arith.constant 9.99999974E-6 : f32
    %24 = vector.broadcast %cst_9 : f32 to vector<128x1xf32>
    %25 = arith.addf %23, %24 : vector<128x1xf32>
    %26 = math.rsqrt %25 : vector<128x1xf32>
    %27 = vector.broadcast %26 : vector<128x1xf32> to vector<128x128xf32>
    %28 = arith.mulf %11, %27 : vector<128x128xf32>
    %c0_10 = arith.constant 0 : index
    %c0_11 = arith.constant 0 : index
    %29 = vector.load %arg4[%c0_10, %c0_11] : memref<1x128xf32, #tpu.memory_space<vmem>>, vector<1x128xf32>
    %30 = vector.broadcast %29 : vector<1x128xf32> to vector<128x128xf32>
    %31 = arith.mulf %28, %30 : vector<128x128xf32>
    %c0_12 = arith.constant 0 : index
    %c0_13 = arith.constant 0 : index
    %32 = vector.load %arg5[%c0_12, %c0_13] : memref<1x128xf32, #tpu.memory_space<vmem>>, vector<1x128xf32>
    %33 = vector.broadcast %32 : vector<1x128xf32> to vector<128x128xf32>
    %34 = arith.addf %31, %33 : vector<128x128xf32>
    %c0_14 = arith.constant 0 : index
    %c0_15 = arith.constant 0 : index
    %35 = vector.load %arg6[%c0_14, %c0_15] : memref<128x128xf32, #tpu.memory_space<vmem>>, vector<128x128xf32>
    tpu.vector_store %arg6[%c0_14, %c0_15], %34 {strides = array<i32>} : memref<128x128xf32, #tpu.memory_space<vmem>>, vector<128x128xf32>,
    return
  }
  func.func @transform_0(%arg0: i32) -> (i32, i32) {
    %c0_i32 = arith.constant 0 : i32
    %c0_i32_0 = arith.constant 0 : i32
    return %arg0, %c0_i32 : i32, i32
  }
  func.func @transform_1(%arg0: i32) -> (i32, i32) {
    %c0_i32 = arith.constant 0 : i32
    %c0_i32_0 = arith.constant 0 : i32
    %c0_i32_1 = arith.constant 0 : i32
    return %c0_i32, %c0_i32_0 : i32, i32
  }
  func.func @transform_2(%arg0: i32) -> (i32, i32) {
    %c0_i32 = arith.constant 0 : i32
    %c0_i32_0 = arith.constant 0 : i32
    %c0_i32_1 = arith.constant 0 : i32
    return %c0_i32, %c0_i32_0 : i32, i32
  }
  func.func @transform_3(%arg0: i32) -> (i32, i32) {
    %c0_i32 = arith.constant 0 : i32
    %c0_i32_0 = arith.constant 0 : i32
    %c0_i32_1 = arith.constant 0 : i32
    return %c0_i32, %c0_i32_0 : i32, i32
  }
  func.func @transform_4(%arg0: i32) -> (i32, i32) {
    %c0_i32 = arith.constant 0 : i32
    %c0_i32_0 = arith.constant 0 : i32
    %c0_i32_1 = arith.constant 0 : i32
    return %c0_i32, %c0_i32_0 : i32, i32
  }
  func.func @transform_5(%arg0: i32) -> (i32, i32) {
    %c0_i32 = arith.constant 0 : i32
    %c0_i32_0 = arith.constant 0 : i32
    return %arg0, %c0_i32 : i32, i32
  }
}

</mosaic_0001>

<bundles_post_ra>
// kernel: tpu_custom_call.1
= control target key start
LH: loop header
LB: loop body
LE: loop exit
PB: predicated region body
PF: predicated region fallthrough
CT: control target
= control target key end

     0   :  { %10 = vsyncpa [#allocation3], 0  ;;  %s1439_s0 = inlined_call_operand.hbm [shape: bf16[128,256], index: 0, kind: input, shape index: {}]   ;;  %s1440_s1 = inlined_call_operand.hbm [shape: bf16[256,128], index: 1, kind: input, shape index: {}]   ;;  %s1441_s2 = inlined_call_operand.vmem [shape: f32[1,128], index: 2, kind: input, shape index: {}]   ;;  %s1442_s3 = inlined_call_operand.vmem [shape: f32[1,128], index: 3, kind: input, shape index: {}]   ;;  %s1443_s4 = inlined_call_operand.vmem [shape: f32[1,128], index: 4, kind: input, shape index: {}]   ;;  %s1444_s5 = inlined_call_operand.hbm [shape: f32[128,128], index: 5, kind: output, shape index: {}]  }
   0x1   :  { %11 = vsyncpa [#allocation6], 0 }
   0x2   :  { %12 = vsyncpa [#allocation4], 0  ;;  %s17_s20 = sshll.u32 %s1439_s0, 4  ;;  %s1094_s21 = smov [#allocation2]   ;;  %s18_s20 = int_to_ptr.hbm [resolvable:$true] %s17_s20 }
   0x3   :  { %s19_s22 = sshll.u32 %s1094_s21, 4  ;;  %s30_s25 = sshll.u32 %s1440_s1, 4  ;;  %s20_s22 = int_to_ptr.vmem [resolvable:$true] %s19_s22  ;;  %s31_s25 = int_to_ptr.hbm [resolvable:$true] %s30_s25 }
   0x4   :  { %s1095_s26 = smov 128   ;;  %s1096_s27 = smov 8  }
   0x5   :  { %25 = dma.hbm_to_vmem [thread:$0]  %s18_s20, 2048, %s20_s22, [#allocation3], %s1095_s26, %s1095_s26, %s1096_s27  }
   0x6   :  { %s1097_s28 = smov [#allocation5]   ;;  %s1098_s30 = smov 64  }
   0x7   :  { %s32_s29 = sshll.u32 %s1097_s28, 4  ;;  %s1099_s0 = smov 4   ;;  %s33_s29 = int_to_ptr.vmem [resolvable:$true] %s32_s29 }
   0x8   :  { %38 = dma.hbm_to_vmem [thread:$0]  %s31_s25, 2048, %s33_s29, [#allocation6], %s1098_s30, %s1098_s30, %s1099_s0  }
   0x9   :  { %1088 = dma.done.wait [#allocation3], 2048  }
   0xa   :  { %1089 = vsyncadd [#allocation3], 4294965248 }
   0xb   :  { %1090 = dma.done.wait [#allocation6], 2048  }
   0xc   :  { %1091 = vsyncadd [#allocation6], 4294965248  ;;  %v948_v0 = vld [vmem:[#allocation5 + $0x38] sm:$0xff]  ;;  %v947_v2 = vld [vmem:[#allocation5 + $0x30] sm:$0xff]  ;;  %s782_s12 = sshll.u32 %s1444_s5, 4  ;;  %s783_s12 = int_to_ptr.hbm [resolvable:$true] %s782_s12 }
   0xd   :  { %v956_v1 = vld [vmem:[#allocation5 + $0x78] sm:$0xff]  ;;  %281 = vmatpush.bf16.msra.mxu0 %v948_v0  ;;  %957 = vmatpush.bf16.msra.mxu2 %v948_v0  ;;  %v955_v3 = vld [vmem:[#allocation5 + $0x70] sm:$0xff]  ;;  %v946_v4 = vld [vmem:[#allocation5 + $0x28] sm:$0xff] }
   0xe   :  { %330 = vmatpush.bf16.msra.mxu1 %v956_v1  ;;  %965 = vmatpush.bf16.msra.mxu3 %v956_v1  ;;  %v954_v5 = vld [vmem:[#allocation5 + $0x68] sm:$0xff]  ;;  %v945_v6 = vld [vmem:[#allocation5 + $0x20] sm:$0xff]  ;;  %v944_v8 = vld [vmem:[#allocation5 + $0x18] sm:$0xff] }
   0xf   :  { %v953_v7 = vld [vmem:[#allocation5 + $0x60] sm:$0xff]  ;;  %v952_v9 = vld [vmem:[#allocation5 + $0x58] sm:$0xff]  ;;  %v943_v10 = vld [vmem:[#allocation5 + $0x10] sm:$0xff] }
  0x10   :  { %v951_v11 = vld [vmem:[#allocation5 + $0x50] sm:$0xff]  ;;  %v942_v12 = vld [vmem:[#allocation5 + $0x8] sm:$0xff]  ;;  %v941_v14 = vld [vmem:[#allocation5] sm:$0xff] }
  0x11   :  { %282 = vmatpush.bf16.msra.mxu0 %v947_v2  ;;  %958 = vmatpush.bf16.msra.mxu2 %v947_v2  ;;  %v950_v13 = vld [vmem:[#allocation5 + $0x48] sm:$0xff]  ;;  %v949_v15 = vld [vmem:[#allocation5 + $0x40] sm:$0xff]  ;;  %v806_v28 = vld [vmem:[#allocation2 + $0x10] sm:$0xf] }
  0x12   :  { %331 = vmatpush.bf16.msra.mxu1 %v955_v3  ;;  %966 = vmatpush.bf16.msra.mxu3 %v955_v3  ;;  %v798_v16 = vld [vmem:[#allocation2] sm:$0xf]  ;;  %v926_v17 = vld [vmem:[#allocation2 + $0x4] sm:$0xf0]  ;;  %v925_v20 = vld [vmem:[#allocation2 + $0x4] sm:$0xf] }
  0x13   :  { %v830_v18 = vld [vmem:[#allocation2 + $0x40] sm:$0xf]  ;;  %v934_v19 = vld [vmem:[#allocation2 + $0x44] sm:$0xf0]  ;;  %v800_v21 = vld [vmem:[#allocation2 + $0x8] sm:$0xf0]  ;;  %v799_v24 = vor.u32 %v926_v17, %v798_v16 }
  0x14   :  { %v933_v22 = vld [vmem:[#allocation2 + $0x44] sm:$0xf]  ;;  %v832_v23 = vld [vmem:[#allocation2 + $0x48] sm:$0xf0]  ;;  %v831_v25 = vor.u32 %v934_v19, %v830_v18  ;;  %v803_v26 = vor.u32 %v925_v20, %v800_v21  ;;  %v928_v29 = vld [vmem:[#allocation2 + $0x14] sm:$0xf0] }
  0x15   :  { %283 = vmatpush.bf16.msra.mxu0 %v946_v4  ;;  %959 = vmatpush.bf16.msra.mxu2 %v946_v4  ;;  %v835_v27 = vor.u32 %v933_v22, %v832_v23  ;;  %v838_v30 = vld [vmem:[#allocation2 + $0x50] sm:$0xf]  ;;  %v936_v31 = vld [vmem:[#allocation2 + $0x54] sm:$0xf0]  ;;  %v927_v32 = vld [vmem:[#allocation2 + $0x14] sm:$0xf]  ;;  %v807_v36 = vor.u32 %v928_v29, %v806_v28 }
  0x16   :  { %332 = vmatpush.bf16.msra.mxu1 %v954_v5  ;;  %967 = vmatpush.bf16.msra.mxu3 %v954_v5  ;;  %v808_v33 = vld [vmem:[#allocation2 + $0x18] sm:$0xf0]  ;;  %v935_v34 = vld [vmem:[#allocation2 + $0x54] sm:$0xf]  ;;  %v839_v37 = vor.u32 %v936_v31, %v838_v30  ;;  %v814_v40 = vld [vmem:[#allocation2 + $0x20] sm:$0xf] }
  0x17   :  { %v840_v35 = vld [vmem:[#allocation2 + $0x58] sm:$0xf0]  ;;  %v811_v38 = vor.u32 %v927_v32, %v808_v33  ;;  %v930_v41 = vld [vmem:[#allocation2 + $0x24] sm:$0xf0]  ;;  %v846_v42 = vld [vmem:[#allocation2 + $0x60] sm:$0xf] }
  0x18   :  { %v843_v39 = vor.u32 %v935_v34, %v840_v35  ;;  %v938_v43 = vld [vmem:[#allocation2 + $0x64] sm:$0xf0]  ;;  %v929_v44 = vld [vmem:[#allocation2 + $0x24] sm:$0xf]  ;;  %v816_v45 = vld [vmem:[#allocation2 + $0x28] sm:$0xf0]  ;;  %v815_v48 = vor.u32 %v930_v41, %v814_v40 }
  0x19   :  { %284 = vmatpush.bf16.msra.mxu0 %v945_v6  ;;  %960 = vmatpush.bf16.msra.mxu2 %v945_v6  ;;  %v937_v46 = vld [vmem:[#allocation2 + $0x64] sm:$0xf]  ;;  %v848_v47 = vld [vmem:[#allocation2 + $0x68] sm:$0xf0]  ;;  %v847_v49 = vor.u32 %v938_v43, %v846_v42  ;;  %v819_v50 = vor.u32 %v929_v44, %v816_v45  ;;  %v822_v52 = vld [vmem:[#allocation2 + $0x30] sm:$0xf] }
  0x1a   :  { %333 = vmatpush.bf16.msra.mxu1 %v953_v7  ;;  %968 = vmatpush.bf16.msra.mxu3 %v953_v7  ;;  %v851_v51 = vor.u32 %v937_v46, %v848_v47  ;;  %v932_v53 = vld [vmem:[#allocation2 + $0x34] sm:$0xf0]  ;;  %v854_v54 = vld [vmem:[#allocation2 + $0x70] sm:$0xf]  ;;  %v931_v56 = vld [vmem:[#allocation2 + $0x34] sm:$0xf] }
  0x1b   :  { %v940_v55 = vld [vmem:[#allocation2 + $0x74] sm:$0xf0]  ;;  %v824_v57 = vld [vmem:[#allocation2 + $0x38] sm:$0xf0]  ;;  %v939_v58 = vld [vmem:[#allocation2 + $0x74] sm:$0xf]  ;;  %v823_v60 = vor.u32 %v932_v53, %v822_v52 }
  0x1c   :  { %v856_v59 = vld [vmem:[#allocation2 + $0x78] sm:$0xf0]  ;;  %v855_v61 = vor.u32 %v940_v55, %v854_v54  ;;  %v827_v62 = vor.u32 %v931_v56, %v824_v57  ;;  %v1144_v0 = vld [vmem:[%s1441_s2] ss:$0 sm:$0xff] }
  0x1d   :  { %285 = vmatpush.bf16.msra.mxu0 %v944_v8  ;;  %961 = vmatpush.bf16.msra.mxu2 %v944_v8  ;;  %v859_v63 = vor.u32 %v939_v58, %v856_v59 }
  0x1e   :  { %334 = vmatpush.bf16.msra.mxu1 %v952_v9  ;;  %969 = vmatpush.bf16.msra.mxu3 %v952_v9 }
  0x21   :  { %286 = vmatpush.bf16.msra.mxu0 %v943_v10  ;;  %962 = vmatpush.bf16.msra.mxu2 %v943_v10 }
  0x22   :  { %335 = vmatpush.bf16.msra.mxu1 %v951_v11  ;;  %970 = vmatpush.bf16.msra.mxu3 %v951_v11 }
  0x25   :  { %287 = vmatpush.bf16.msra.mxu0 %v942_v12  ;;  %963 = vmatpush.bf16.msra.mxu2 %v942_v12 }
  0x26   :  { %336 = vmatpush.bf16.msra.mxu1 %v950_v13  ;;  %971 = vmatpush.bf16.msra.mxu3 %v950_v13 }
  0x29   :  { %288 = vmatpush.bf16.msra.mxu0 %v941_v14  ;;  %964 = vmatpush.bf16.msra.mxu2 %v941_v14 }
  0x2a   :  { %337 = vmatpush.bf16.msra.mxu1 %v949_v15  ;;  %972 = vmatpush.bf16.msra.mxu3 %v949_v15 }
  0x2c   :  { %289 = vmatmul.bf16.vlgmr.msra.gmra.mxu0 %v799_v24  ;;  %309 = vmatmul.bf16.vlgmr.msra.gmra.mxu2 %v831_v25 }
  0x2d   :  { %338 = vmatmul.bf16.vlgmr.msra.gmra.mxu1 %v803_v26  ;;  %358 = vmatmul.bf16.vlgmr.msra.gmra.mxu3 %v835_v27 }
  0x3c   :  { %294 = vmatmul.bf16.gmra.mxu0 %v807_v36  ;;  %314 = vmatmul.bf16.gmra.mxu2 %v839_v37 }
  0x3d   :  { %343 = vmatmul.bf16.gmra.mxu1 %v811_v38  ;;  %363 = vmatmul.bf16.gmra.mxu3 %v843_v39 }
  0x4c   :  { %299 = vmatmul.bf16.gmra.mxu0 %v815_v48  ;;  %319 = vmatmul.bf16.gmra.mxu2 %v847_v49 }
  0x4d   :  { %348 = vmatmul.bf16.gmra.mxu1 %v819_v50  ;;  %368 = vmatmul.bf16.gmra.mxu3 %v851_v51 }
  0x5c   :  { %304 = vmatmul.bf16.gmra.mxu0 %v823_v60  ;;  %324 = vmatmul.bf16.gmra.mxu2 %v855_v61 }
  0x5d   :  { %353 = vmatmul.bf16.gmra.mxu1 %v827_v62  ;;  %373 = vmatmul.bf16.gmra.mxu3 %v859_v63 }
  0xa9   :  { %v290_v1 = vpop.f32.mrf.mxu0 }
  0xaa   :  { %v291_v2 = vadd.f32 %v1144_v0, %v290_v1  ;;  %v339_v3 = vpop.f32.mrf.mxu1 }
  0xac   :  { %v1147_v4 = vadd.f32 %v339_v3, %v291_v2  ;;  %v443_v2 = vlaneseq }
  0xae   :  { %379 = vadd.xlane.f32.xlu0 %v1147_v4  ;;  %v444_v3 = vand.u32 127, %v443_v2 }
  0xaf   :  { %v310_v5 = vpop.f32.mrf.mxu2 }
  0xb0   :  { %v311_v6 = vadd.f32 %v1144_v0, %v310_v5  ;;  %v359_v7 = vpop.f32.mrf.mxu3  ;;  %vm445_vm0 = vcmp.lt.s32.totalorder %v444_v3, 32 }
  0xb1   :  { %v292_v8 = vpop.f32.mrf.mxu0 }
  0xb2   :  { %v1151_v9 = vadd.f32 %v359_v7, %v311_v6  ;;  %v293_v10 = vadd.f32 %v1144_v0, %v292_v8  ;;  %v341_v11 = vpop.f32.mrf.mxu1  ;;  %v1100_v8 = vmov 0.0  }
  0xb4   :  { %v1154_v12 = vadd.f32 %v341_v11, %v293_v10  ;;  %395 = vadd.xlane.f32.xlu2 %v1151_v9  ;;  %v1213_v10 = vsel %vm445_vm0, 1.0, %v1100_v8 }
  0xb6   :  { %381 = vadd.xlane.f32.xlu0 %v1154_v12 }
  0xb7   :  { %v312_v13 = vpop.f32.mrf.mxu2 }
  0xb8   :  { %v313_v14 = vadd.f32 %v1144_v0, %v312_v13  ;;  %v361_v15 = vpop.f32.mrf.mxu3 }
  0xb9   :  { %v295_v16 = vpop.f32.mrf.mxu0 }
  0xba   :  { %v296_v17 = vadd.f32 %v1144_v0, %v295_v16  ;;  %v344_v18 = vpop.f32.mrf.mxu1  ;;  %v1160_v19 = vadd.f32 %v361_v15, %v313_v14 }
  0xbc   :  { %v1162_v20 = vadd.f32 %v344_v18, %v296_v17 }
  0xbe   :  { %383 = vadd.xlane.f32.xlu1 %v1162_v20  ;;  %397 = vadd.xlane.f32.xlu0 %v1160_v19 }
  0xbf   :  { %v315_v21 = vpop.f32.mrf.mxu2 }
  0xc0   :  { %v316_v22 = vadd.f32 %v1144_v0, %v315_v21  ;;  %v364_v23 = vpop.f32.mrf.mxu3 }
  0xc1   :  { %v297_v24 = vpop.f32.mrf.mxu0 }
  0xc2   :  { %v1167_v25 = vadd.f32 %v364_v23, %v316_v22  ;;  %v346_v26 = vpop.f32.mrf.mxu1  ;;  %v298_v28 = vadd.f32 %v1144_v0, %v297_v24 }
  0xc4   :  { %v1174_v34 = vadd.f32 %v346_v26, %v298_v28 }
  0xc6   :  { %399 = vadd.xlane.f32.xlu1 %v1167_v25 }
  0xc7   :  { %v317_v27 = vpop.f32.mrf.mxu2 }
  0xc8   :  { %v318_v29 = vadd.f32 %v1144_v0, %v317_v27  ;;  %v366_v30 = vpop.f32.mrf.mxu3 }
  0xc9   :  { %v300_v31 = vpop.f32.mrf.mxu0 }
  0xca   :  { %v1172_v32 = vadd.f32 %v366_v30, %v318_v29  ;;  %v349_v33 = vpop.f32.mrf.mxu1  ;;  %v301_v35 = vadd.f32 %v1144_v0, %v300_v31 }
  0xcc   :  { %401 = vadd.xlane.f32.xlu2 %v1172_v32  ;;  %v1180_v40 = vadd.f32 %v349_v33, %v301_v35 }
  0xce   :  { %385 = vadd.xlane.f32.xlu1 %v1174_v34 }
  0xcf   :  { %v320_v36 = vpop.f32.mrf.mxu2 }
  0xd0   :  { %v321_v37 = vadd.f32 %v1144_v0, %v320_v36  ;;  %v369_v38 = vpop.f32.mrf.mxu3 }
  0xd1   :  { %v302_v39 = vpop.f32.mrf.mxu0 }
  0xd2   :  { %v1182_v41 = vadd.f32 %v369_v38, %v321_v37  ;;  %v351_v42 = vpop.f32.mrf.mxu1  ;;  %v303_v43 = vadd.f32 %v1144_v0, %v302_v39 }
  0xd4   :  { %387 = vadd.xlane.f32.xlu2 %v1180_v40  ;;  %403 = vadd.xlane.f32.xlu0 %v1182_v41  ;;  %v1188_v48 = vadd.f32 %v351_v42, %v303_v43 }
  0xd7   :  { %v322_v44 = vpop.f32.mrf.mxu2 }
  0xd8   :  { %v323_v45 = vadd.f32 %v1144_v0, %v322_v44  ;;  %v371_v46 = vpop.f32.mrf.mxu3 }
  0xd9   :  { %v305_v47 = vpop.f32.mrf.mxu0 }
  0xda   :  { %v1190_v49 = vadd.f32 %v371_v46, %v323_v45  ;;  %v306_v50 = vadd.f32 %v1144_v0, %v305_v47  ;;  %v354_v51 = vpop.f32.mrf.mxu1 }
  0xdc   :  { %v1193_v52 = vadd.f32 %v354_v51, %v306_v50  ;;  %389 = vadd.xlane.f32.xlu2 %v1188_v48  ;;  %405 = vadd.xlane.f32.xlu1 %v1190_v49 }
  0xde   :  { %391 = vadd.xlane.f32.xlu0 %v1193_v52 }
  0xdf   :  { %v325_v53 = vpop.f32.mrf.mxu2 }
  0xe0   :  { %v326_v54 = vadd.f32 %v1144_v0, %v325_v53  ;;  %v374_v55 = vpop.f32.mrf.mxu3 }
  0xe1   :  { %v307_v56 = vpop.f32.mrf.mxu0 }
  0xe2   :  { %v1199_v57 = vadd.f32 %v374_v55, %v326_v54  ;;  %v308_v58 = vadd.f32 %v1144_v0, %v307_v56  ;;  %v356_v59 = vpop.f32.mrf.mxu1 }
  0xe4   :  { %v1202_v60 = vadd.f32 %v356_v59, %v308_v58  ;;  %407 = vadd.xlane.f32.xlu2 %v1199_v57 }
  0xe6   :  { %393 = vadd.xlane.f32.xlu1 %v1202_v60 }
  0xe7   :  { %v327_v61 = vpop.f32.mrf.mxu2 }
  0xe8   :  { %v328_v62 = vadd.f32 %v1144_v0, %v327_v61  ;;  %v376_v63 = vpop.f32.mrf.mxu3 }
  0xea   :  { %v1207_v1 = vadd.f32 %v376_v63, %v328_v62 }
  0xec   :  { %409 = vadd.xlane.f32.xlu0 %v1207_v1 }
 0x121   :  { %v380_v5 = vpop.xlane.xlu0 %379 }
 0x122   :  { %v411_v6 = vmul.f32 0.03125, %v380_v5 }
 0x124   :  { %v1211_v7 = vsub.f32 %v1147_v4, %v411_v6 }
 0x126   :  { %v448_v11 = vmul.f32 %v1211_v7, %v1211_v7 }
 0x127   :  { %v396_v0 = vpop.xlane.xlu2 %395 }
 0x128   :  { %v419_v13 = vmul.f32 0.03125, %v396_v0  ;;  %v464_v14 = vmul.f32 %v1213_v10, %v448_v11 }
 0x129   :  { %v382_v15 = vpop.xlane.xlu0 %381 }
 0x12a   :  { %v1219_v16 = vsub.f32 %v1151_v9, %v419_v13  ;;  %v412_v17 = vmul.f32 0.03125, %v382_v15  ;;  %480 = vadd.xlane.f32.xlu1 %v464_v14 }
 0x12c   :  { %v1222_v18 = vsub.f32 %v1154_v12, %v412_v17  ;;  %v456_v4 = vmul.f32 %v1219_v16, %v1219_v16 }
 0x12e   :  { %v472_v21 = vmul.f32 %v1213_v10, %v456_v4  ;;  %v449_v22 = vmul.f32 %v1222_v18, %v1222_v18 }
 0x130   :  { %496 = vadd.xlane.f32.xlu0 %v472_v21  ;;  %v465_v23 = vmul.f32 %v1213_v10, %v449_v22 }
 0x131   :  { %v384_v24 = vpop.xlane.xlu1 %383  ;;  %v398_v26 = vpop.xlane.xlu0 %397 }
 0x132   :  { %v413_v9 = vmul.f32 0.03125, %v384_v24  ;;  %v420_v27 = vmul.f32 0.03125, %v398_v26  ;;  %482 = vadd.xlane.f32.xlu2 %v465_v23 }
 0x134   :  { %v1231_v28 = vsub.f32 %v1162_v20, %v413_v9  ;;  %v1234_v12 = vsub.f32 %v1160_v19, %v420_v27 }
 0x136   :  { %v450_v29 = vmul.f32 %v1231_v28, %v1231_v28  ;;  %v457_v30 = vmul.f32 %v1234_v12, %v1234_v12 }
 0x138   :  { %v466_v31 = vmul.f32 %v1213_v10, %v450_v29  ;;  %v473_v33 = vmul.f32 %v1213_v10, %v457_v30 }
 0x139   :  { %v400_v35 = vpop.xlane.xlu1 %399 }
 0x13a   :  { %v421_v36 = vmul.f32 0.03125, %v400_v35  ;;  %484 = vadd.xlane.f32.xlu0 %v466_v31  ;;  %498 = vadd.xlane.f32.xlu1 %v473_v33 }
 0x13c   :  { %v1243_v20 = vsub.f32 %v1167_v25, %v421_v36 }
 0x13e   :  { %v458_v19 = vmul.f32 %v1243_v20, %v1243_v20 }
 0x13f   :  { %v402_v37 = vpop.xlane.xlu2 %401 }
 0x140   :  { %v422_v38 = vmul.f32 0.03125, %v402_v37  ;;  %v474_v39 = vmul.f32 %v1213_v10, %v458_v19 }
 0x141   :  { %v386_v42 = vpop.xlane.xlu1 %385 }
 0x142   :  { %v1249_v43 = vsub.f32 %v1172_v32, %v422_v38  ;;  %v414_v44 = vmul.f32 0.03125, %v386_v42  ;;  %500 = vadd.xlane.f32.xlu2 %v474_v39 }
 0x144   :  { %v1252_v45 = vsub.f32 %v1174_v34, %v414_v44  ;;  %v459_v25 = vmul.f32 %v1249_v43, %v1249_v43 }
 0x146   :  { %v475_v46 = vmul.f32 %v1213_v10, %v459_v25  ;;  %v451_v47 = vmul.f32 %v1252_v45, %v1252_v45 }
 0x147   :  { %v388_v50 = vpop.xlane.xlu2 %387  ;;  %v404_v51 = vpop.xlane.xlu0 %403 }
 0x148   :  { %v415_v53 = vmul.f32 0.03125, %v388_v50  ;;  %v423_v54 = vmul.f32 0.03125, %v404_v51  ;;  %502 = vadd.xlane.f32.xlu0 %v475_v46  ;;  %v467_v32 = vmul.f32 %v1213_v10, %v451_v47 }
 0x14a   :  { %v1261_v55 = vsub.f32 %v1180_v40, %v415_v53  ;;  %v1264_v34 = vsub.f32 %v1182_v41, %v423_v54  ;;  %486 = vadd.xlane.f32.xlu1 %v467_v32 }
 0x14c   :  { %v452_v56 = vmul.f32 %v1261_v55, %v1261_v55  ;;  %v460_v58 = vmul.f32 %v1264_v34, %v1264_v34 }
 0x14e   :  { %v468_v59 = vmul.f32 %v1213_v10, %v452_v56  ;;  %v476_v63 = vmul.f32 %v1213_v10, %v460_v58 }
 0x14f   :  { %v390_v61 = vpop.xlane.xlu2 %389  ;;  %v406_v2 = vpop.xlane.xlu1 %405 }
 0x150   :  { %v416_v62 = vmul.f32 0.03125, %v390_v61  ;;  %488 = vadd.xlane.f32.xlu2 %v468_v59 }
 0x151   :  { %v392_v40 = vpop.xlane.xlu0 %391 }
 0x152   :  { %v1273_v3 = vsub.f32 %v1188_v48, %v416_v62  ;;  %v417_v41 = vmul.f32 0.03125, %v392_v40  ;;  %504 = vadd.xlane.f32.xlu1 %v476_v63 }
 0x154   :  { %v1276_v5 = vsub.f32 %v1193_v52, %v417_v41  ;;  %v453_v6 = vmul.f32 %v1273_v3, %v1273_v3  ;;  %v424_v52 = vmul.f32 0.03125, %v406_v2  ;;  %v1315_v2 = vld [vmem:[%s1442_s3] ss:$0 sm:$0xff]  ;;  %s1101_s3 = smov [#allocation7]  }
 0x156   :  { %v469_v8 = vmul.f32 %v1213_v10, %v453_v6  ;;  %v454_v11 = vmul.f32 %v1276_v5, %v1276_v5  ;;  %v1296_v26 = vsub.f32 %v1190_v49, %v424_v52 }
 0x157   :  { %v408_v0 = vpop.xlane.xlu2 %407 }
 0x158   :  { %v425_v13 = vmul.f32 0.03125, %v408_v0  ;;  %490 = vadd.xlane.f32.xlu0 %v469_v8  ;;  %v470_v14 = vmul.f32 %v1213_v10, %v454_v11  ;;  %v461_v29 = vmul.f32 %v1296_v26, %v1296_v26  ;;  %v1322_v8 = vld [vmem:[%s1443_s4] ss:$0 sm:$0xff]  ;;  %s780_s4 = sshll.u32 %s1101_s3, 4  ;;  %s781_s4 = int_to_ptr.vmem [resolvable:$true] %s780_s4 }
 0x159   :  { %v394_v48 = vpop.xlane.xlu1 %393 }
 0x15a   :  { %v1285_v15 = vsub.f32 %v1199_v57, %v425_v13  ;;  %v418_v17 = vmul.f32 0.03125, %v394_v48  ;;  %492 = vadd.xlane.f32.xlu1 %v470_v14  ;;  %v477_v49 = vmul.f32 %v1213_v10, %v461_v29 }
 0x15c   :  { %v1288_v4 = vsub.f32 %v1202_v60, %v418_v17  ;;  %v462_v21 = vmul.f32 %v1285_v15, %v1285_v15 }
 0x15e   :  { %v478_v22 = vmul.f32 %v1213_v10, %v462_v21  ;;  %v455_v23 = vmul.f32 %v1288_v4, %v1288_v4 }
 0x15f   :  { %v410_v24 = vpop.xlane.xlu0 %409 }
 0x160   :  { %v426_v57 = vmul.f32 0.03125, %v410_v24  ;;  %508 = vadd.xlane.f32.xlu0 %v478_v22  ;;  %v471_v9 = vmul.f32 %v1213_v10, %v455_v23 }
 0x162   :  { %v1300_v27 = vsub.f32 %v1207_v1, %v426_v57  ;;  %494 = vadd.xlane.f32.xlu2 %v471_v9 }
 0x164   :  { %v463_v60 = vmul.f32 %v1300_v27, %v1300_v27 }
 0x166   :  { %v479_v30 = vmul.f32 %v1213_v10, %v463_v60 }
 0x168   :  { %510 = vadd.xlane.f32.xlu1 %v479_v30 }
 0x16a   :  { %506 = vadd.xlane.f32.xlu2 %v477_v49 }
 0x19d   :  { %v481_v31 = vpop.xlane.xlu1 %480 }
 0x19e   :  { %v512_v33 = vmul.f32 0.03125, %v481_v31 }
 0x1a0   :  { %v528_v35 = vadd.f32 1e-05, %v512_v33 }
 0x1a2   :  { %984 = vrsqrt.f32 %v528_v35  ;;  %vm550_vm2 = vweird.f32 %v528_v35 }
 0x1a3   :  { %v497_v36 = vpop.xlane.xlu0 %496 }
 0x1a4   :  { %v520_v1 = vmul.f32 0.03125, %v497_v36 }
 0x1a5   :  { %v483_v19 = vpop.xlane.xlu2 %482 }
 0x1a6   :  { %v536_v37 = vadd.f32 1e-05, %v520_v1  ;;  %v513_v38 = vmul.f32 0.03125, %v483_v19 }
 0x1a8   :  { %v985_v39 = vpop.eup %984  ;;  %986 = vrsqrt.f32 %v536_v37  ;;  %v529_v42 = vadd.f32 1e-05, %v513_v38  ;;  %vm630_vm5 = vweird.f32 %v536_v37 }
 0x1a9   :  { %v545_v44 = vmul.f32 %v985_v39, %v528_v35  ;;  %vm551_vm1 = vweird.f32 %v985_v39 }
 0x1aa   :  { %988 = vrsqrt.f32 %v529_v42  ;;  %vm552_vm3 = vmor %vm550_vm2, %vm551_vm1  ;;  %vm560_vm8 = vweird.f32 %v529_v42 }
 0x1ab   :  { %v546_v25 = vmul.f32 %v985_v39, %v545_v44 }
 0x1ad   :  { %v547_v46 = vmul.f32 0.5, %v546_v25  ;;  %v499_v47 = vpop.xlane.xlu1 %498  ;;  %v485_v50 = vpop.xlane.xlu0 %484 }
 0x1ae   :  { %v987_v10 = vpop.eup %986  ;;  %v521_v51 = vmul.f32 0.03125, %v499_v47  ;;  %v514_v53 = vmul.f32 0.03125, %v485_v50 }
 0x1af   :  { %v548_v54 = vsub.f32 1.5, %v547_v46  ;;  %v625_v32 = vmul.f32 %v987_v10, %v536_v37  ;;  %vm631_vm4 = vweird.f32 %v987_v10 }
 0x1b0   :  { %v989_v56 = vpop.eup %988  ;;  %v1308_v58 = vadd.f32 1e-05, %v521_v51  ;;  %v1310_v59 = vadd.f32 1e-05, %v514_v53  ;;  %vm632_vm7 = vmor %vm630_vm5, %vm631_vm4 }
 0x1b1   :  { %v549_v61 = vmul.f32 %v985_v39, %v548_v54  ;;  %v626_v62 = vmul.f32 %v987_v10, %v625_v32  ;;  %v555_v63 = vmul.f32 %v989_v56, %v529_v42  ;;  %vm561_vm6 = vweird.f32 %v989_v56 }
 0x1b2   :  { %990 = vrsqrt.f32 %v1308_v58  ;;  %vm562_vm9 = vmor %vm560_vm8, %vm561_vm6  ;;  %vm640_vm12 = vweird.f32 %v1308_v58  ;;  %vm570_vm14 = vweird.f32 %v1310_v59 }
 0x1b3   :  { %v553_v40 = vsel %vm552_vm3, %v985_v39, %v549_v61  ;;  %v627_v41 = vmul.f32 0.5, %v626_v62  ;;  %v556_v6 = vmul.f32 %v989_v56, %v555_v63  ;;  %992 = vrsqrt.f32 %v1310_v59 }
 0x1b4   :  { %v704_v11 = vmul.f32 %v553_v40, %v1211_v7 }
 0x1b5   :  { %v628_v0 = vsub.f32 1.5, %v627_v41  ;;  %v557_v13 = vmul.f32 0.5, %v556_v6  ;;  %v501_v14 = vpop.xlane.xlu2 %500 }
 0x1b6   :  { %v724_v48 = vmul.f32 %v1315_v2, %v704_v11  ;;  %v522_v17 = vmul.f32 0.03125, %v501_v14 }
 0x1b7   :  { %v629_v52 = vmul.f32 %v987_v10, %v628_v0  ;;  %v558_v21 = vsub.f32 1.5, %v557_v13 }
 0x1b8   :  { %v991_v22 = vpop.eup %990  ;;  %v744_v23 = vadd.f32 %v1322_v8, %v724_v48  ;;  %v1327_v24 = vadd.f32 1e-05, %v522_v17 }
 0x1b9   :  { %v993_v57 = vpop.eup %992  ;;  %v633_v9 = vsel %vm632_vm7, %v987_v10, %v629_v52  ;;  %v559_v7 = vmul.f32 %v989_v56, %v558_v21  ;;  %v635_v60 = vmul.f32 %v991_v22, %v1308_v58  ;;  %vm641_vm10 = vweird.f32 %v991_v22 }
 0x1ba   :  { %760 = vst [vmem:[#allocation7] sm:$0xff] %v744_v23  ;;  %v712_v29 = vmul.f32 %v633_v9, %v1219_v16  ;;  %v565_v30 = vmul.f32 %v993_v57, %v1310_v59  ;;  %994 = vrsqrt.f32 %v1327_v24  ;;  %vm571_vm11 = vweird.f32 %v993_v57  ;;  %vm642_vm13 = vmor %vm640_vm12, %vm641_vm10 }
 0x1bb   :  { %v563_v49 = vsel %vm562_vm9, %v989_v56, %v559_v7  ;;  %v636_v31 = vmul.f32 %v991_v22, %v635_v60  ;;  %v503_v33 = vpop.xlane.xlu0 %502  ;;  %vm572_vm15 = vmor %vm570_vm14, %vm571_vm11  ;;  %vm650_vm1 = vweird.f32 %v1327_v24 }
 0x1bc   :  { %v732_v35 = vmul.f32 %v1315_v2, %v712_v29  ;;  %v705_v36 = vmul.f32 %v563_v49, %v1222_v18  ;;  %v566_v1 = vmul.f32 %v993_v57, %v565_v30  ;;  %v523_v19 = vmul.f32 0.03125, %v503_v33 }
 0x1bd   :  { %v637_v37 = vmul.f32 0.5, %v636_v31  ;;  %v487_v38 = vpop.xlane.xlu1 %486 }
 0x1be   :  { %v752_v39 = vadd.f32 %v1322_v8, %v732_v35  ;;  %v725_v16 = vmul.f32 %v1315_v2, %v705_v36  ;;  %v567_v42 = vmul.f32 0.5, %v566_v1  ;;  %v1337_v44 = vadd.f32 1e-05, %v523_v19 }
 0x1bf   :  { %v638_v25 = vsub.f32 1.5, %v637_v37  ;;  %v515_v46 = vmul.f32 0.03125, %v487_v38 }
 0x1c0   :  { %v995_v47 = vpop.eup %994  ;;  %768 = vst [vmem:[#allocation7 + $0x40] sm:$0xff] %v752_v39  ;;  %v745_v50 = vadd.f32 %v1322_v8, %v725_v16  ;;  %v568_v10 = vsub.f32 1.5, %v567_v42  ;;  %996 = vrsqrt.f32 %v1337_v44  ;;  %vm660_vm4 = vweird.f32 %v1337_v44 }
 0x1c1   :  { %v639_v18 = vmul.f32 %v991_v22, %v638_v25  ;;  %v645_v51 = vmul.f32 %v995_v47, %v1327_v24  ;;  %v1343_v53 = vadd.f32 1e-05, %v515_v46  ;;  %vm651_vm0 = vweird.f32 %v995_v47 }
 0x1c2   :  { %761 = vst [vmem:[#allocation7 + $0x8] sm:$0xff] %v745_v50  ;;  %v569_v54 = vmul.f32 %v993_v57, %v568_v10  ;;  %vm652_vm2 = vmor %vm650_vm1, %vm651_vm0 }
 0x1c3   :  { %v643_v32 = vsel %vm642_vm13, %v991_v22, %v639_v18  ;;  %v646_v56 = vmul.f32 %v995_v47, %v645_v51  ;;  %998 = vrsqrt.f32 %v1343_v53  ;;  %v489_v61 = vpop.xlane.xlu2 %488  ;;  %vm580_vm7 = vweird.f32 %v1343_v53 }
 0x1c4   :  { %v713_v62 = vmul.f32 %v643_v32, %v1234_v12  ;;  %v573_v63 = vsel %vm572_vm15, %v993_v57, %v569_v54  ;;  %v516_v40 = vmul.f32 0.03125, %v489_v61 }
 0x1c5   :  { %v706_v58 = vmul.f32 %v573_v63, %v1231_v28  ;;  %v647_v41 = vmul.f32 0.5, %v646_v56  ;;  %v505_v6 = vpop.xlane.xlu1 %504 }
 0x1c6   :  { %v997_v11 = vpop.eup %996  ;;  %v733_v0 = vmul.f32 %v1315_v2, %v713_v62  ;;  %v1350_v13 = vadd.f32 1e-05, %v516_v40  ;;  %v524_v59 = vmul.f32 0.03125, %v505_v6 }
 0x1c7   :  { %v726_v14 = vmul.f32 %v1315_v2, %v706_v58  ;;  %v648_v48 = vsub.f32 1.5, %v647_v41  ;;  %v655_v17 = vmul.f32 %v997_v11, %v1337_v44  ;;  %vm661_vm3 = vweird.f32 %v997_v11 }
 0x1c8   :  { %v753_v12 = vadd.f32 %v1322_v8, %v733_v0  ;;  %1000 = vrsqrt.f32 %v1350_v13  ;;  %v1356_v52 = vadd.f32 1e-05, %v524_v59  ;;  %vm662_vm5 = vmor %vm660_vm4, %vm661_vm3  ;;  %vm590_vm10 = vweird.f32 %v1350_v13 }
 0x1c9   :  { %v999_v28 = vpop.eup %998  ;;  %v746_v21 = vadd.f32 %v1322_v8, %v726_v14  ;;  %v649_v22 = vmul.f32 %v995_v47, %v648_v48  ;;  %v656_v23 = vmul.f32 %v997_v11, %v655_v17 }
 0x1ca   :  { %769 = vst [vmem:[#allocation7 + $0x48] sm:$0xff] %v753_v12  ;;  %v575_v57 = vmul.f32 %v999_v28, %v1343_v53  ;;  %1002 = vrsqrt.f32 %v1356_v52  ;;  %vm581_vm6 = vweird.f32 %v999_v28  ;;  %vm670_vm13 = vweird.f32 %v1356_v52 }
 0x1cb   :  { %762 = vst [vmem:[#allocation7 + $0x10] sm:$0xff] %v746_v21  ;;  %v653_v9 = vsel %vm652_vm2, %v995_v47, %v649_v22  ;;  %v657_v7 = vmul.f32 0.5, %v656_v23  ;;  %v491_v60 = vpop.xlane.xlu0 %490  ;;  %vm582_vm8 = vmor %vm580_vm7, %vm581_vm6 }
 0x1cc   :  { %v714_v29 = vmul.f32 %v653_v9, %v1243_v20  ;;  %v576_v30 = vmul.f32 %v999_v28, %v575_v57  ;;  %v517_v49 = vmul.f32 0.03125, %v491_v60 }
 0x1cd   :  { %v658_v31 = vsub.f32 1.5, %v657_v7  ;;  %v493_v33 = vpop.xlane.xlu1 %492 }
 0x1ce   :  { %v1001_v35 = vpop.eup %1000  ;;  %v734_v24 = vmul.f32 %v1315_v2, %v714_v29  ;;  %v577_v36 = vmul.f32 0.5, %v576_v30  ;;  %v1364_v1 = vadd.f32 1e-05, %v517_v49  ;;  %v518_v19 = vmul.f32 0.03125, %v493_v33 }
 0x1cf   :  { %v659_v37 = vmul.f32 %v997_v11, %v658_v31  ;;  %v585_v38 = vmul.f32 %v1001_v35, %v1350_v13  ;;  %vm591_vm9 = vweird.f32 %v1001_v35 }
 0x1d0   :  { %v1003_v39 = vpop.eup %1002  ;;  %v754_v20 = vadd.f32 %v1322_v8, %v734_v24  ;;  %v578_v16 = vsub.f32 1.5, %v577_v36  ;;  %1004 = vrsqrt.f32 %v1364_v1  ;;  %v1373_v44 = vadd.f32 1e-05, %v518_v19  ;;  %vm592_vm12 = vmor %vm590_vm10, %vm591_vm9 }
 0x1d1   :  { %v663_v42 = vsel %vm662_vm5, %v997_v11, %v659_v37  ;;  %v586_v25 = vmul.f32 %v1001_v35, %v585_v38  ;;  %v665_v46 = vmul.f32 %v1003_v39, %v1356_v52  ;;  %vm671_vm11 = vweird.f32 %v1003_v39 }
 0x1d2   :  { %770 = vst [vmem:[#allocation7 + $0x50] sm:$0xff] %v754_v20  ;;  %v715_v47 = vmul.f32 %v663_v42, %v1249_v43  ;;  %v579_v50 = vmul.f32 %v999_v28, %v578_v16  ;;  %1006 = vrsqrt.f32 %v1373_v44  ;;  %vm672_vm14 = vmor %vm670_vm13, %vm671_vm11  ;;  %vm600_vm0 = vweird.f32 %v1364_v1 }
 0x1d3   :  { %v587_v10 = vmul.f32 0.5, %v586_v25  ;;  %v666_v18 = vmul.f32 %v1003_v39, %v665_v46  ;;  %v509_v51 = vpop.xlane.xlu0 %508  ;;  %vm610_vm3 = vweird.f32 %v1373_v44 }
 0x1d4   :  { %v735_v54 = vmul.f32 %v1315_v2, %v715_v47  ;;  %v583_v32 = vsel %vm582_vm8, %v999_v28, %v579_v50  ;;  %v526_v43 = vmul.f32 0.03125, %v509_v51 }
 0x1d5   :  { %v707_v56 = vmul.f32 %v583_v32, %v1252_v45  ;;  %v588_v61 = vsub.f32 1.5, %v587_v10  ;;  %v667_v62 = vmul.f32 0.5, %v666_v18  ;;  %v495_v63 = vpop.xlane.xlu2 %494 }
 0x1d6   :  { %v1005_v40 = vpop.eup %1004  ;;  %v755_v53 = vadd.f32 %v1322_v8, %v735_v54  ;;  %v519_v58 = vmul.f32 0.03125, %v495_v63  ;;  %v1384_v45 = vadd.f32 1e-05, %v526_v43 }
 0x1d7   :  { %v727_v41 = vmul.f32 %v1315_v2, %v707_v56  ;;  %v589_v6 = vmul.f32 %v1001_v35, %v588_v61  ;;  %v668_v11 = vsub.f32 1.5, %v667_v62  ;;  %v595_v0 = vmul.f32 %v1005_v40, %v1364_v1 }
 0x1d8   :  { %771 = vst [vmem:[#allocation7 + $0x58] sm:$0xff] %v755_v53  ;;  %v1386_v59 = vadd.f32 1e-05, %v519_v58  ;;  %v1007_v12 = vpop.eup %1006  ;;  %1008 = vrsqrt.f32 %v1384_v45  ;;  %vm601_vm15 = vweird.f32 %v1005_v40  ;;  %vm690_vm6 = vweird.f32 %v1384_v45 }
 0x1d9   :  { %v747_v14 = vadd.f32 %v1322_v8, %v727_v41  ;;  %v593_v13 = vsel %vm592_vm12, %v1001_v35, %v589_v6  ;;  %v669_v48 = vmul.f32 %v1003_v39, %v668_v11  ;;  %v596_v17 = vmul.f32 %v1005_v40, %v595_v0  ;;  %vm602_vm1 = vmor %vm600_vm0, %vm601_vm15 }
 0x1da   :  { %v708_v28 = vmul.f32 %v593_v13, %v1261_v55  ;;  %v605_v52 = vmul.f32 %v1007_v12, %v1373_v44  ;;  %1010 = vrsqrt.f32 %v1386_v59  ;;  %vm611_vm2 = vweird.f32 %v1007_v12 }
 0x1db   :  { %763 = vst [vmem:[#allocation7 + $0x18] sm:$0xff] %v747_v14  ;;  %v673_v21 = vsel %vm672_vm14, %v1003_v39, %v669_v48  ;;  %v597_v22 = vmul.f32 0.5, %v596_v17  ;;  %v511_v23 = vpop.xlane.xlu1 %510  ;;  %vm612_vm4 = vmor %vm610_vm3, %vm611_vm2  ;;  %vm620_vm9 = vweird.f32 %v1386_v59 }
 0x1dc   :  { %v728_v57 = vmul.f32 %v1315_v2, %v708_v28  ;;  %v716_v9 = vmul.f32 %v673_v21, %v1264_v34  ;;  %v527_v7 = vmul.f32 0.03125, %v511_v23  ;;  %v606_v55 = vmul.f32 %v1007_v12, %v605_v52 }
 0x1dd   :  { %v598_v60 = vsub.f32 1.5, %v597_v22  ;;  %v507_v29 = vpop.xlane.xlu2 %506 }
 0x1de   :  { %v748_v30 = vadd.f32 %v1322_v8, %v728_v57  ;;  %v736_v49 = vmul.f32 %v1315_v2, %v716_v9  ;;  %v1398_v31 = vadd.f32 1e-05, %v527_v7  ;;  %v525_v33 = vmul.f32 0.03125, %v507_v29  ;;  %v1009_v36 = vpop.eup %1008 }
 0x1df   :  { %v599_v35 = vmul.f32 %v1005_v40, %v598_v60  ;;  %v607_v24 = vmul.f32 0.5, %v606_v55  ;;  %v685_v39 = vmul.f32 %v1009_v36, %v1384_v45  ;;  %vm691_vm5 = vweird.f32 %v1009_v36 }
 0x1e0   :  { %764 = vst [vmem:[#allocation7 + $0x20] sm:$0xff] %v748_v30  ;;  %v756_v34 = vadd.f32 %v1322_v8, %v736_v49  ;;  %1012 = vrsqrt.f32 %v1398_v31  ;;  %v1403_v19 = vadd.f32 1e-05, %v525_v33  ;;  %v1011_v20 = vpop.eup %1010  ;;  %vm692_vm8 = vmor %vm690_vm6, %vm691_vm5  ;;  %vm700_vm12 = vweird.f32 %v1398_v31 }
 0x1e1   :  { %v603_v37 = vsel %vm602_vm1, %v1005_v40, %v599_v35  ;;  %v608_v38 = vsub.f32 1.5, %v607_v24  ;;  %v686_v42 = vmul.f32 %v1009_v36, %v685_v39  ;;  %v615_v25 = vmul.f32 %v1011_v20, %v1386_v59 }
 0x1e2   :  { %772 = vst [vmem:[#allocation7 + $0x60] sm:$0xff] %v756_v34  ;;  %v709_v16 = vmul.f32 %v603_v37, %v1273_v3  ;;  %1014 = vrsqrt.f32 %v1403_v19  ;;  %vm621_vm7 = vweird.f32 %v1011_v20  ;;  %vm680_vm15 = vweird.f32 %v1403_v19 }
 0x1e3   :  { %v609_v1 = vmul.f32 %v1007_v12, %v608_v38  ;;  %v687_v50 = vmul.f32 0.5, %v686_v42  ;;  %v616_v10 = vmul.f32 %v1011_v20, %v615_v25  ;;  %vm622_vm10 = vmor %vm620_vm9, %vm621_vm7 }
 0x1e4   :  { %v729_v46 = vmul.f32 %v1315_v2, %v709_v16 }
 0x1e5   :  { %v613_v47 = vsel %vm612_vm4, %v1007_v12, %v609_v1  ;;  %v688_v3 = vsub.f32 1.5, %v687_v50  ;;  %v617_v32 = vmul.f32 0.5, %v616_v10 }
 0x1e6   :  { %v1013_v18 = vpop.eup %1012  ;;  %v749_v51 = vadd.f32 %v1322_v8, %v729_v46  ;;  %v710_v54 = vmul.f32 %v613_v47, %v1276_v5 }
 0x1e7   :  { %v695_v56 = vmul.f32 %v1013_v18, %v1398_v31  ;;  %v689_v62 = vmul.f32 %v1009_v36, %v688_v3  ;;  %v618_v43 = vsub.f32 1.5, %v617_v32  ;;  %vm701_vm11 = vweird.f32 %v1013_v18 }
 0x1e8   :  { %v1015_v44 = vpop.eup %1014  ;;  %765 = vst [vmem:[#allocation7 + $0x28] sm:$0xff] %v749_v51  ;;  %v730_v61 = vmul.f32 %v1315_v2, %v710_v54  ;;  %vm702_vm14 = vmor %vm700_vm12, %vm701_vm11 }
 0x1e9   :  { %v696_v63 = vmul.f32 %v1013_v18, %v695_v56  ;;  %v675_v40 = vmul.f32 %v1015_v44, %v1403_v19  ;;  %v693_v5 = vsel %vm692_vm8, %v1009_v36, %v689_v62  ;;  %v619_v58 = vmul.f32 %v1011_v20, %v618_v43 }
 0x1ea   :  { %v750_v53 = vadd.f32 %v1322_v8, %v730_v61  ;;  %v718_v11 = vmul.f32 %v693_v5, %v1285_v15  ;;  %vm681_vm13 = vweird.f32 %v1015_v44 }
 0x1eb   :  { %v697_v41 = vmul.f32 0.5, %v696_v63  ;;  %v676_v6 = vmul.f32 %v1015_v44, %v675_v40  ;;  %v623_v0 = vsel %vm622_vm10, %v1011_v20, %v619_v58  ;;  %vm682_vm0 = vmor %vm680_vm15, %vm681_vm13 }
 0x1ec   :  { %766 = vst [vmem:[#allocation7 + $0x30] sm:$0xff] %v750_v53  ;;  %v738_v13 = vmul.f32 %v1315_v2, %v718_v11  ;;  %v711_v48 = vmul.f32 %v623_v0, %v1288_v4 }
 0x1ed   :  { %v698_v45 = vsub.f32 1.5, %v697_v41  ;;  %v677_v14 = vmul.f32 0.5, %v676_v6 }
 0x1ee   :  { %v758_v12 = vadd.f32 %v1322_v8, %v738_v13  ;;  %v731_v28 = vmul.f32 %v1315_v2, %v711_v48 }
 0x1ef   :  { %v699_v17 = vmul.f32 %v1013_v18, %v698_v45  ;;  %v678_v59 = vsub.f32 1.5, %v677_v14 }
 0x1f0   :  { %774 = vst [vmem:[#allocation7 + $0x70] sm:$0xff] %v758_v12  ;;  %v751_v22 = vadd.f32 %v1322_v8, %v731_v28 }
 0x1f1   :  { %v703_v15 = vsel %vm702_vm14, %v1013_v18, %v699_v17  ;;  %v679_v21 = vmul.f32 %v1015_v44, %v678_v59 }
 0x1f2   :  { %v719_v52 = vmul.f32 %v703_v15, %v1300_v27  ;;  %767 = vst [vmem:[#allocation7 + $0x38] sm:$0xff] %v751_v22 }
 0x1f3   :  { %v683_v4 = vsel %vm682_vm0, %v1015_v44, %v679_v21 }
 0x1f4   :  { %v739_v23 = vmul.f32 %v1315_v2, %v719_v52  ;;  %v717_v57 = vmul.f32 %v683_v4, %v1296_v26 }
 0x1f6   :  { %v759_v9 = vadd.f32 %v1322_v8, %v739_v23  ;;  %v737_v7 = vmul.f32 %v1315_v2, %v717_v57 }
 0x1f8   :  { %775 = vst [vmem:[#allocation7 + $0x78] sm:$0xff] %v759_v9  ;;  %v757_v27 = vadd.f32 %v1322_v8, %v737_v7 }
 0x1fa   :  { %773 = vst [vmem:[#allocation7 + $0x68] sm:$0xff] %v757_v27 }
 0x1fb   :  { %788 = dma.vmem_to_hbm [thread:$0]  %s781_s4, 2048, %s783_s12, [#allocation4], %s1095_s26, %s1095_s26, %s1096_s27  }
 0x1fc   :  { %1092 = dma.done.wait [#allocation4], 2048  }
 0x1fd   :  { %1093 = vsyncadd [#allocation4], 4294965248 }
 0x1fe   :  { %793 = vsyncpa [#allocation3], 1 }
 0x1ff   :  { %794 = vsyncpa [#allocation6], 1 }
 0x200   :  { %795 = vsyncpa [#allocation4], 1 }

</bundles_post_ra>
